<compile_context>
chip_gen: v7x
topology: tpu7x:2x2x1
jax: 0.10.0
libtpu: 0.0.40
codegen_flags: <defaults>
</compile_context>

<pallas_src>
import jax
import jax.numpy as jnp
from jax import lax
from jax.experimental import pallas as pl
from jax.experimental.pallas import tpu as pltpu

# ----------------------------- sizes -----------------------------------
D_RAW = 64            # raw-encoder input features
H_RAW = 32            # raw-encoder output channels
T_FB, D_FB = 500, 40  # hard-coded torch.randn(1, 500, 40) in forward()
T_PAD = 512           # lane-dense padding of the 500 time steps (4 x 128)
C_CAT = H_RAW + T_FB  # channels after cat along dim=1 (532)
C_OUT = 64            # conv output channels
N_CLS = 16            # decoder output classes
BN_EPS = 1e-5

# Packed-constant layout inside the single (16, 768) f32 weight buffer.
# All column offsets are multiples of 128 (clean lane-tile-aligned slices).
_PK_ROWS, _PK_COLS = 16, 768
_RAW_COL0 = 512       # rows :,  cols 512:576 -> folded raw-path weight (16, 64)
_MISC_COL0 = 640      # row 0,   cols 640:680 -> fbanks_encoder weight  (1, 40)
                      # row 8,   cols 640:656 -> fully folded bias      (1, 16)


# ----------------------------- kernel -----------------------------------
def _fused_kernel(x_ref, x1_ref, wpk_ref, o_ref):
    # Static, tile-aligned views into the packed constant buffer.
    fb_w = wpk_ref[0:1, _MISC_COL0:_MISC_COL0 + D_FB]         # (1, 40)
    w_fb_t = wpk_ref[:, 0:T_PAD]                              # (16, 512)
    w_raw_t = wpk_ref[:, _RAW_COL0:_RAW_COL0 + D_RAW]         # (16, 64)
    b_all = wpk_ref[8:9, _MISC_COL0:_MISC_COL0 + N_CLS]       # (1, 16)

    # fbanks_encoder, lane-dense: (1, 40) @ (40, 512) -> (1, 512).
    # (bias + pad columns are handled by the zero weight columns / folded bias)
    h_fb = jnp.dot(fb_w, x1_ref[...], preferred_element_type=jnp.float32)

    # raw_encoder + cat + BatchNorm(eval) + Conv1d(k=1) + transpose + decoder,
    # all folded at init into two weight blocks (stored transposed, lane-dense)
    # and one bias.  Contract on the last dims (A @ B.T on the MXU).
    nt = (((1,), (1,)), ((), ()))
    o_ref[...] = (
        lax.dot_general(x_ref[...], w_raw_t, nt, preferred_element_type=jnp.float32)
        + lax.dot_general(h_fb, w_fb_t, nt, preferred_element_type=jnp.float32)
        + b_all
    )


_VMEM = pl.BlockSpec(memory_space=pltpu.MemorySpace.VMEM)

_fused_call = pl.pallas_call(
    _fused_kernel,
    out_shape=jax.ShapeDtypeStruct((1, N_CLS), jnp.float32),
    in_specs=[_VMEM, _VMEM, _VMEM],
    out_specs=_VMEM,
)


@jax.jit
def forward(params, x, key):
    """Mirrors test_comlex.forward.  x: (1, D_RAW) f32 -> (1, 1, N_CLS) f32."""
    # x1 = torch.randn(1, 500, 40): i.i.d. normals, drawn directly in the
    # transposed / lane-padded (40, 512) layout the kernel wants (the extra
    # 12 columns only multiply zero weight columns, so padding is exact).
    x1_t = jax.random.normal(key, (D_FB, T_PAD), jnp.float32)
    out = _fused_call(x, x1_t, params["wpk"])
    # transpose(1, 2) + decoder are folded; restore the (N, L=1, N_CLS) shape.
    return out.reshape(1, 1, N_CLS)


# --------------------------- parameters ---------------------------------
def _init_linear(key, fan_in, fan_out):
    kw, kb = jax.random.split(key)
    bound = 1.0 / (fan_in ** 0.5)   # torch.nn.Linear / Conv1d default init range
    w = jax.random.uniform(kw, (fan_in, fan_out), jnp.float32, -bound, bound)
    b = jax.random.uniform(kb, (1, fan_out), jnp.float32, -bound, bound)
    return w, b


def init_params(key):
    k_raw, k_fb, k_conv, k_dec = jax.random.split(key, 4)
    raw_w, raw_b = _init_linear(k_raw, D_RAW, H_RAW)      # raw_encoder
    fb_w, fb_b = _init_linear(k_fb, D_FB, 1)              # fbanks_encoder
    conv_w, conv_b = _init_linear(k_conv, C_CAT, C_OUT)   # Conv1d(k=1) as matmul
    dec_w, dec_b = _init_linear(k_dec, C_OUT, N_CLS)      # decoder

    # BatchNorm1d(C_CAT), eval mode, default stats: gamma=1, beta=0, mean=0, var=1.
    bn_scale = jnp.full((1, C_CAT), 1.0 / jnp.sqrt(1.0 + BN_EPS), jnp.float32)
    bn_shift = jnp.zeros((1, C_CAT), jnp.float32)

    # Fold BN into the conv weights (exact affine absorption in eval mode).
    conv_w_bn = conv_w * bn_scale.T                        # (C_CAT, C_OUT)
    conv_b_bn = conv_b + bn_shift @ conv_w                 # (1, C_OUT)

    # Fold conv(k=1) -> decoder (no nonlinearity in between).
    w_cd = conv_w_bn @ dec_w                               # (C_CAT, N_CLS)
    b_cd = conv_b_bn @ dec_w + dec_b                       # (1, N_CLS)

    # Split along the cat axis (removes the concat).
    w_cd_raw = w_cd[:H_RAW]                                # (H_RAW, N_CLS)
    w_cd_fb = w_cd[H_RAW:]                                 # (T_FB, N_CLS)

    # Fold the (linear, activation-free) raw_encoder straight through.
    w_raw_eff = raw_w @ w_cd_raw                           # (D_RAW, N_CLS)
    b_all = (raw_b @ w_cd_raw                              # raw bias
             + fb_b * jnp.sum(w_cd_fb, axis=0, keepdims=True)  # fbanks bias
             + b_cd)                                       # conv+decoder bias

    # Pack every constant operand into one lane-dense (16, 768) buffer:
    #   cols   0:512 -> w_cd_fb^T  (zero-padded cols 500:512)
    #   cols 512:576 -> w_raw_eff^T
    #   row 0, cols 640:680 -> fbanks weight row;  row 8, cols 640:656 -> bias.
    wpk = jnp.zeros((_PK_ROWS, _PK_COLS), jnp.float32)
    wpk = wpk.at[:, :T_FB].set(w_cd_fb.T)
    wpk = wpk.at[:, _RAW_COL0:_RAW_COL0 + D_RAW].set(w_raw_eff.T)
    wpk = wpk.at[0, _MISC_COL0:_MISC_COL0 + D_FB].set(fb_w[:, 0])
    wpk = wpk.at[8, _MISC_COL0:_MISC_COL0 + N_CLS].set(b_all[0])
    return {"wpk": wpk}


# ------------------------------- main ------------------------------------
if __name__ == "__main__":
    key = jax.random.PRNGKey(0)
    k_params, k_x, k_randn = jax.random.split(key, 3)

    params = init_params(k_params)
    x = jax.random.normal(k_x, (1, D_RAW), jnp.float32)

    # Fresh randoms per forward call (torch.randn semantics): vary k_randn.
    out = forward(params, x, k_randn)
    out = jax.block_until_ready(out)

    assert out.shape == (1, 1, N_CLS) and out.dtype == jnp.float32
    assert bool(jnp.all(jnp.isfinite(out)))
    print("KERNEL_OK")
</pallas_src>

<mosaic_0001>
module attributes {stable_mosaic.version = 11 : i64} {
  func.func @_fused_kernel(%arg0: memref<1x64xf32, #tpu.memory_space<vmem>>, %arg1: memref<40x512xf32, #tpu.memory_space<vmem>>, %arg2: memref<16x768xf32, #tpu.memory_space<vmem>>, %arg3: memref<1x16xf32, #tpu.memory_space<vmem>>) attributes {dimension_semantics = [], scalar_prefetch = 0 : i64, scratch_operands = 0 : i64, tpu.core_type = #tpu.core_type<tc>} {
    %c0 = arith.constant 0 : index
    %c640 = arith.constant 640 : index
    %0 = vector.load %arg2[%c0, %c640] : memref<16x768xf32, #tpu.memory_space<vmem>>, vector<1x40xf32>
    %c0_0 = arith.constant 0 : index
    %c0_1 = arith.constant 0 : index
    %1 = vector.load %arg2[%c0_0, %c0_1] : memref<16x768xf32, #tpu.memory_space<vmem>>, vector<16x512xf32>
    %c0_2 = arith.constant 0 : index
    %c512 = arith.constant 512 : index
    %2 = vector.load %arg2[%c0_2, %c512] : memref<16x768xf32, #tpu.memory_space<vmem>>, vector<16x64xf32>
    %c8 = arith.constant 8 : index
    %c640_3 = arith.constant 640 : index
    %3 = vector.load %arg2[%c8, %c640_3] : memref<16x768xf32, #tpu.memory_space<vmem>>, vector<1x16xf32>
    %c0_4 = arith.constant 0 : index
    %c0_5 = arith.constant 0 : index
    %4 = vector.load %arg1[%c0_4, %c0_5] : memref<40x512xf32, #tpu.memory_space<vmem>>, vector<40x512xf32>
    %cst = arith.constant dense<0.000000e+00> : vector<1x512xf32>
    %5 = tpu.matmul %0, %4, %cst {dimension_numbers = #tpu.dot_dimension_numbers<[1], [0], [0], [1], [0, 0, 1, 1], [], []>} : vector<1x40xf32>, vector<40x512xf32>, vector<1x512xf32> -> vector<1x512xf32>
    %c0_6 = arith.constant 0 : index
    %c0_7 = arith.constant 0 : index
    %6 = vector.load %arg0[%c0_6, %c0_7] : memref<1x64xf32, #tpu.memory_space<vmem>>, vector<1x64xf32>
    %cst_8 = arith.constant dense<0.000000e+00> : vector<1x16xf32>
    %7 = tpu.matmul %6, %2, %cst_8 {dimension_numbers = #tpu.dot_dimension_numbers<[1], [1], [0], [0], [0, 0, 1, 0], [], []>} : vector<1x64xf32>, vector<16x64xf32>, vector<1x16xf32> -> vector<1x16xf32>
    %cst_9 = arith.constant dense<0.000000e+00> : vector<1x16xf32>
    %8 = tpu.matmul %5, %1, %cst_9 {dimension_numbers = #tpu.dot_dimension_numbers<[1], [1], [0], [0], [0, 0, 1, 0], [], []>} : vector<1x512xf32>, vector<16x512xf32>, vector<1x16xf32> -> vector<1x16xf32>
    %9 = arith.addf %7, %8 : vector<1x16xf32>
    %10 = arith.addf %9, %3 : vector<1x16xf32>
    %c0_10 = arith.constant 0 : index
    %c0_11 = arith.constant 0 : index
    %11 = vector.load %arg3[%c0_10, %c0_11] : memref<1x16xf32, #tpu.memory_space<vmem>>, vector<1x16xf32>
    tpu.vector_store %arg3[%c0_10, %c0_11], %10 {strides = array<i32>} : memref<1x16xf32, #tpu.memory_space<vmem>>, vector<1x16xf32>,
    return
  }
}

</mosaic_0001>

<bundles_post_ra>
// kernel: forward.1
= control target key start
LH: loop header
LB: loop body
LE: loop exit
PB: predicated region body
PF: predicated region fallthrough
CT: control target
= control target key end

     0   :  { %v502_v7 = vmov 0.0   ;;  %s640_s0 = inlined_call_operand.vmem [shape: f32[1,64], index: 0, kind: input, shape index: {}]   ;;  %s641_s1 = inlined_call_operand.vmem [shape: f32[40,512], index: 1, kind: input, shape index: {}]   ;;  %s642_s2 = inlined_call_operand.vmem [shape: f32[16,768], index: 2, kind: input, shape index: {}]   ;;  %s643_s3 = inlined_call_operand.hbm [shape: f32[1,16], index: 3, kind: output, shape index: {}]  }
   0x1   :  { %v28_v0 = vld [vmem:[%s641_s1 + $0x8] sm:$0xff]  ;;  %v30_v2 = vld [vmem:[%s641_s1 + $0x18] sm:$0xff]  ;;  %v27_v5 = vld [vmem:[%s641_s1] sm:$0xff]  ;;  %115 = vmatprep.mubr.f32.mxu0 %v502_v7  ;;  %186 = vmatprep.mubr.f32.mxu1 %v502_v7 }
   0x2   :  { %v32_v1 = vld [vmem:[%s641_s1 + $0x28] sm:$0xff]  ;;  %v34_v4 = vld [vmem:[%s641_s1 + $0x38] sm:$0xff]  ;;  %v31_v6 = vld [vmem:[%s641_s1 + $0x20] sm:$0xff] }
   0x3   :  { %v446_v3 = vpack.c.bf16 %v32_v1, %v28_v0  ;;  %v454_v8 = vpack.c.bf16 %v34_v4, %v30_v2  ;;  %v448_v9 = vpack.c.bf16 %v31_v6, %v27_v5  ;;  %v29_v10 = vld [vmem:[%s641_s1 + $0x10] sm:$0xff]  ;;  %v36_v12 = vld [vmem:[%s641_s1 + $0x48] sm:$0xff]  ;;  %v38_v15 = vld [vmem:[%s641_s1 + $0x58] sm:$0xff] }
   0x4   :  { %v33_v11 = vld [vmem:[%s641_s1 + $0x30] sm:$0xff]  ;;  %v40_v14 = vld [vmem:[%s641_s1 + $0x68] sm:$0xff]  ;;  %v42_v16 = vld [vmem:[%s641_s1 + $0x78] sm:$0xff] }
   0x5   :  { %447 = vmatprep.subr.bf16.mxu0 %v446_v3  ;;  %v456_v13 = vpack.c.bf16 %v33_v11, %v29_v10  ;;  %455 = vmatprep.subr.bf16.mxu1 %v454_v8  ;;  %v450_v17 = vpack.c.bf16 %v40_v14, %v36_v12  ;;  %v458_v18 = vpack.c.bf16 %v42_v16, %v38_v15  ;;  %v35_v19 = vld [vmem:[%s641_s1 + $0x40] sm:$0xff]  ;;  %v37_v21 = vld [vmem:[%s641_s1 + $0x50] sm:$0xff]  ;;  %v44_v25 = vld [vmem:[%s641_s1 + $0x88] sm:$0xff] }
   0x6   :  { %449 = vmatpush1.bf16.msra.mxu0 %v448_v9  ;;  %v39_v20 = vld [vmem:[%s641_s1 + $0x60] sm:$0xff]  ;;  %v41_v23 = vld [vmem:[%s641_s1 + $0x70] sm:$0xff]  ;;  %v46_v26 = vld [vmem:[%s641_s1 + $0x98] sm:$0xff] }
   0x7   :  { %457 = vmatpush1.bf16.msra.mxu1 %v456_v13  ;;  %v452_v22 = vpack.c.bf16 %v39_v20, %v35_v19  ;;  %451 = vmatprep.subr.bf16.mxu0 %v450_v17  ;;  %v460_v24 = vpack.c.bf16 %v41_v23, %v37_v21  ;;  %v17_v27 = vld [vmem:[%s642_s2 + $0x8] sm:$0xff]  ;;  %v21_v28 = vld [vmem:[%s642_s2 + $0x38] sm:$0xff]  ;;  %v43_v31 = vld [vmem:[%s641_s1 + $0x80] sm:$0xff] }
   0x8   :  { %459 = vmatprep.subr.bf16.mxu1 %v458_v18  ;;  %v19_v29 = vld [vmem:[%s642_s2 + $0x18] sm:$0xff]  ;;  %v23_v30 = vld [vmem:[%s642_s2 + $0x48] sm:$0xff] }
   0xa   :  { %453 = vmatpush1.bf16.msra.mxu0 %v452_v22 }
   0xb   :  { %461 = vmatpush1.bf16.msra.mxu1 %v460_v24  ;;  %59 = vmatprep.subr.mxu0 %v44_v25 }
   0xc   :  { %8 = vsyncpa [#allocation3], 0  ;;  %130 = vmatprep.subr.mxu1 %v46_v26  ;;  %v45_v32 = vld [vmem:[%s641_s1 + $0x90] sm:$0xff]  ;;  %v15_v33 = vld [vmem:[%s642_s2 + $0x28] ss:$0 sm:$0xff]  ;;  %vm47_vm0 = vcmask 326656   ;;  %v462_v34 = vpack.c.bf16 %v21_v28, %v17_v27  ;;  %v466_v35 = vpack.c.bf16 %v23_v30, %v19_v29 }
   0xd   :  { %v16_v36 = vld [vmem:[%s642_s2] sm:$0xff]  ;;  %v20_v37 = vld [vmem:[%s642_s2 + $0x30] sm:$0xff]  ;;  %v503_v42 = vmov 0.0|0.0   ;;  %vm334_vm1 = vcmask 523264   ;;  %vm504_vm3 = vmmov 0   ;;  %s505_s23 = smov [#allocation2]  }
   0xe   :  { %60 = vmatpush1.msra.mxu0 %v43_v31  ;;  %v18_v38 = vld [vmem:[%s642_s2 + $0x10] sm:$0xff]  ;;  %v22_v39 = vld [vmem:[%s642_s2 + $0x40] sm:$0xff]  ;;  %v464_v40 = vpack.c.bf16 %v20_v37, %v16_v36  ;;  %vm472_vm2 = vmpackc.low %vm334_vm1, %vm334_vm1  ;;  %s423_s24 = sshll.u32 %s505_s23, 4  ;;  %vm415_vm4 = vcmask 122880   ;;  %s424_s24 = int_to_ptr.vmem [resolvable:$true] %s423_s24 }
   0xf   :  { %131 = vmatpush1.msra.mxu1 %v45_v32  ;;  %431 = vmatmul.mubr.msk.f32.vlgmr.msra.gmra.mrb[0].mxu0 %vm47_vm0, %v15_v33  ;;  %v468_v41 = vpack.c.bf16 %v22_v39, %v18_v38  ;;  %v24_v43 = vld [vmem:[%s642_s2 + $0x20] sm:$0xff]  ;;  %v25_v44 = vld [vmem:[%s642_s2 + $0x50] sm:$0xff]  ;;  %v26_v56 = vld [vmem:[%s642_s2 + $0x58] ss:$0 sm:$0xff]  ;;  %s482_s25 = scalar_lea.vmem %s424_s24, 32  ;;  %p483_p1 = scmp.lt.s32.totalorder %s424_s24, %s424_s24 }
  0x10   :  { %432 = vmatmul.mubr.msk.f32.vlgmr.msra.gmra.mrb[0].mxu1 %vm47_vm0, %v15_v33  ;;  %463 = vmatprep.subr.bf16.mxu0 %v462_v34  ;;  %v471_v46 = vpack.c.bf16 %v25_v44, %v24_v43  ;;  %v193_v50 = vld [vmem:[%s640_s0] sm:$0x1]  ;;  %s478_s0 = scalar_lea.vmem %s424_s24, 16 }
  0x11   :  { %467 = vmatprep.subr.bf16.mxu1 %v466_v35  ;;  %p479_p0 = scmp.ne.s32.totalorder %s424_s24, %s478_s0  ;;  %p484_p2 = scmp.lt.s32.totalorder %s482_s25, %s478_s0 }
  0x13   :  { %p485_p3 = por %p484_p2, %p483_p1 }
  0x15   :  { %465 = vmatpush1.bf16.xpose.msra.mxu0 %v464_v40  ;;  %p486_p4 = pnand %p485_p3, %p479_p0 }
  0x16   :  { %469 = vmatpush1.bf16.xpose.msra.mxu1 %v468_v41  ;;  %470 = vmatprep.subr.bf16.mxu0 %v503_v42 }
  0xe2   :  { %v117_v45 = vpop.f32.mrb[0].mxu0 }
  0xe3   :  { %v188_v47 = vpop.f32.mrb[0].mxu1  ;;  %v119_v48 = vpop.f32.mrb[1].mxu0 }
  0xe4   :  { %v190_v49 = vpop.f32.mrb[1].mxu1  ;;  %258 = vmatprep.mubr.f32.mxu0 %v119_v48 }
  0xe5   :  { %328 = vmatprep.mubr.f32.mxu1 %v190_v49  ;;  %259 = vmatmul.mubr.f32.vlgmr.msra.gmra.mrb[2].mxu0 %v117_v45 }
  0xe6   :  { %329 = vmatmul.mubr.f32.vlgmr.msra.gmra.mrb[2].mxu1 %v188_v47  ;;  %473 = vmatpush3.bf16.xpose.msk.msra.mxu0 %vm472_vm2, %v471_v46 }
  0xe7   :  { %443 = vmatprep.mubr.msk.f32.mxu0 %vm504_vm3, %v502_v7 }
  0xed   :  { %444 = vmatmul.mubr.msk.f32.vlgmr.msra.gmra.mrb[4].mxu0 %vm334_vm1, %v193_v50 }
 0x1b8   :  { %v260_v51 = vpop.f32.mrb[2].mxu0 }
 0x1b9   :  { %v330_v52 = vpop.f32.mrb[2].mxu1  ;;  %v262_v53 = vpop.f32.mrb[3].mxu0 }
 0x1ba   :  { %v331_v54 = vadd.f32 %v330_v52, %v260_v51  ;;  %v332_v55 = vpop.f32.mrb[3].mxu1 }
 0x1c0   :  { %v410_v57 = vpop.f32.mrb[4].mxu0 }
 0x1c1   :  { %v411_v58 = vadd.f32 %v410_v57, %v331_v54  ;;  %v445_v59 = vpop.f32.mrb[5].mxu0 }
 0x1c3   :  { %v414_v60 = vadd.f32 %v411_v58, %v26_v56 }
 0x1c5   :  { %416 = vst.msk [vmem:[#allocation2] sm:$0x1] %vm415_vm4, %v414_v60 }
 0x1c6   :  { %489 = shalt.err (!%p486_p4)
}
 0x1c7   :  { %s490_s2 = scalar_lea.hbm %s643_s3, 16 }
 0x1c8   :  { %p491_p5 = scmp.ne.s32.totalorder %s643_s3, %s490_s2  ;;  %p494_p6 = scmp.lt.u32.totalorder %s490_s2, %s643_s3 }
 0x1ca   :  { %p496_p7 = pnand %p494_p6, %p491_p5 }
 0x1cc   :  { %499 = shalt.err (!%p496_p7)
}
 0x1cd   :  { %426 = dma.vmem_to_hbm [thread:$0]  %s424_s24, 16, %s643_s3, [#allocation3]  }
 0x1ce   :  { %500 = dma.done.wait [#allocation3], 16  }
 0x1cf   :  { %501 = vsyncadd [#allocation3], 4294967280 }
 0x1d0   :  { %430 = vsyncpa [#allocation3], 1 }

</bundles_post_ra>
